<compile_context>
chip_gen: v6e
topology: v6e:2x2x1
jax: 0.10.0
libtpu: 0.0.40
codegen_flags: <defaults>
</compile_context>

<pallas_src>
import jax
import jax.numpy as jnp
from jax import lax
from jax.experimental import pallas as pl
from jax.experimental.pallas import tpu as pltpu


def _cdiv(a, b):
    return -(-a // b)


def _vmem_capacity_bytes():
    """Per-chip VMEM capacity, with a conservative fallback (v7x per-TC size)."""
    try:
        info = pltpu.get_tpu_info()
        for name in ("vmem_capacity_bytes", "vmem_size_bytes", "vmem_bytes"):
            cap = getattr(info, name, None)
            if cap:
                return int(cap)
    except Exception:
        pass
    return 64 << 20


def _plan_n_tiling(c, n, vmem_budget_bytes):
    """Pick an N tile (multiple of 128) so live per-step VMEM fits the budget."""
    total_chunks = _cdiv(n, 128)
    # live per step ~= 2x in dbuf + 2x out dbuf + ~2 f32 temps = ~6 * C * TN * 4B
    per_chunk = 6 * c * 4 * 128
    cap_chunks = max(1, vmem_budget_bytes // per_chunk)
    chunks_per_tile = max(1, min(total_chunks, cap_chunks))
    nk = _cdiv(total_chunks, chunks_per_tile)
    chunks_per_tile = _cdiv(total_chunks, nk)       # rebalance so tiles are even
    tn = 128 * chunks_per_tile
    return tn, nk, tn * nk


def _cam0_kernel(gamma_ref, x_ref, o_ref, energy_scr, attn_scr):
    phase = pl.program_id(1)
    k = pl.program_id(2)
    nk = pl.num_programs(2)

    x = x_ref[0]                                    # (C, TN) f32, needed by both phases

    # -------- phase 0: accumulate energy = X X^T over N tiles, then softmax ---
    @pl.when(phase == 0)
    def _():
        @pl.when(k == 0)
        def _():
            energy_scr[...] = jnp.zeros_like(energy_scr)

        # contract the shared N dim on both operands (no explicit transpose);
        # f32 operands + f32 accumulation keep the softmax logits accurate.
        energy_scr[...] += lax.dot_general(
            x, x, (((1,), (1,)), ((), ())),
            preferred_element_type=jnp.float32)

        @pl.when(k == nk - 1)
        def _():
            e = energy_scr[...]
            m = jnp.max(e, axis=-1, keepdims=True)
            p = jnp.exp(e - m)
            attn_scr[...] = p / jnp.sum(p, axis=-1, keepdims=True)

    # -------- phase 1: out_tile = gamma * (attn @ X_tile) + X_tile -------------
    @pl.when(phase == 1)
    def _():
        out = jnp.dot(attn_scr[...], x, preferred_element_type=jnp.float32)
        o_ref[0] = (gamma_ref[0] * out + x).astype(o_ref.dtype)


def cam0_forward(x, gamma):
    """CAM0: out = gamma * (softmax(X X^T) X) + x.

    x: (B, C, H, W) float32, gamma: (1,) float32 -> (B, C, H, W) float32.
    """
    b, c, h, w = x.shape
    n = h * w

    vmem_cap = _vmem_capacity_bytes()
    scratch_bytes = 2 * c * c * 4                       # energy + attn scratches
    budget = max(6 * c * 4 * 128, int(0.45 * vmem_cap) - 2 * scratch_bytes)
    tn, nk, n_pad = _plan_n_tiling(c, n, budget)

    x_flat = x.reshape(b, c, n)
    if n_pad != n:
        # zero padding keeps the energy accumulation exact; padded output
        # columns are sliced off below.
        x_flat = jnp.pad(x_flat, ((0, 0), (0, 0), (0, n_pad - n)))

    # real peak ~= in/out double buffers + f32 temps + CxC scratches; leave
    # generation-aware headroom (<= ~80% of physical VMEM, never the whole die).
    est = 6 * c * tn * 4 + 4 * c * c * 4
    vmem_limit = int(min(max(32 << 20, 2 * est), int(0.8 * vmem_cap)))
    vmem_limit = max(vmem_limit, est + (4 << 20))

    out_flat = pl.pallas_call(
        _cam0_kernel,
        out_shape=jax.ShapeDtypeStruct((b, c, n_pad), x.dtype),
        grid_spec=pltpu.PrefetchScalarGridSpec(
            num_scalar_prefetch=0,
            grid=(b, 2, nk),                              # (batch, phase, N tiles)
            in_specs=[
                pl.BlockSpec(memory_space=pltpu.SMEM),                     # gamma
                pl.BlockSpec((1, c, tn), lambda bi, p, k: (bi, 0, k)),     # x tile
            ],
            # phase 0 never writes: pin its output block index to tile 0 so no
            # buffer is flushed to HBM until phase 1 has written real values.
            out_specs=pl.BlockSpec((1, c, tn), lambda bi, p, k: (bi, 0, p * k)),
            scratch_shapes=[
                pltpu.VMEM((c, c), jnp.float32),   # energy accumulator (resident)
                pltpu.VMEM((c, c), jnp.float32),   # softmax(energy)
            ],
        ),
        compiler_params=pltpu.CompilerParams(
            dimension_semantics=("parallel", "arbitrary", "arbitrary"),
            vmem_limit_bytes=vmem_limit,
        ),
    )(gamma, x_flat)

    if n_pad != n:
        # TODO(synk): write only the valid N range from the kernel (masked vst on
        # the last tile) so unaligned H*W avoids this extra HBM slice pass.
        out_flat = out_flat[:, :, :n]
    return out_flat.reshape(b, c, h, w)


def cam0_reference(x, gamma):
    b, c, h, w = x.shape
    xf = x.reshape(b, c, -1)
    energy = jnp.einsum("bcn,bdn->bcd", xf, xf, precision=lax.Precision.HIGHEST)
    attn = jax.nn.softmax(energy, axis=-1)
    out = jnp.einsum("bcd,bdn->bcn", attn, xf,
                     precision=lax.Precision.HIGHEST).reshape(b, c, h, w)
    return gamma[0] * out + x


if __name__ == "__main__":
    key = jax.random.PRNGKey(0)
    k1, k2 = jax.random.split(key)

    # module operates on B x C x H x W feature maps
    B, C, H, W = 2, 8, 16, 16
    x = jax.random.normal(k1, (B, C, H, W), dtype=jnp.float32)

    # nn.Parameter(torch.zeros(1)) -> gamma = 0 at init (output == input exactly)
    gamma0 = jnp.zeros((1,), dtype=jnp.float32)
    out0 = cam0_forward(x, gamma0)
    jax.block_until_ready(out0)
    assert jnp.allclose(out0, cam0_reference(x, gamma0), atol=1e-5, rtol=1e-5)

    # nonzero gamma exercises the attention path (f32 MXU, resident CxC scratch)
    gamma1 = jnp.array([0.5], dtype=jnp.float32)
    out1 = cam0_forward(x, gamma1)
    jax.block_until_ready(out1)
    assert jnp.allclose(out1, cam0_reference(x, gamma1), atol=2e-2, rtol=2e-2)

    # non-aligned C and H*W exercise the unpadded-C path and the N pad/slice path
    B2, C2, H2, W2 = 3, 5, 7, 7
    x2 = jax.random.normal(k2, (B2, C2, H2, W2), dtype=jnp.float32)
    out2 = cam0_forward(x2, gamma1)
    jax.block_until_ready(out2)
    assert jnp.allclose(out2, cam0_reference(x2, gamma1), atol=2e-2, rtol=2e-2)

    print("KERNEL_OK")
</pallas_src>

<mosaic_0001>
module attributes {stable_mosaic.version = 11 : i64} {
  func.func @_cam0_kernel(%arg0: i32, %arg1: i32, %arg2: i32, %arg3: memref<1xf32, #tpu.memory_space<smem>>, %arg4: memref<1x8x256xf32, #tpu.memory_space<vmem>>, %arg5: memref<1x8x256xf32, #tpu.memory_space<vmem>>, %arg6: memref<8x8xf32, #tpu.memory_space<vmem>>, %arg7: memref<8x8xf32, #tpu.memory_space<vmem>>) attributes {dimension_semantics = [#tpu.dimension_semantics<parallel>, #tpu.dimension_semantics<arbitrary>, #tpu.dimension_semantics<arbitrary>], iteration_bounds = array<i64: 2, 2, 1>, scalar_prefetch = 0 : i64, scratch_operands = 2 : i64, tpu.core_type = #tpu.core_type<tc>, window_params = [{transform_indices = @transform_0, window_bounds = array<i64: 1>}, {transform_indices = @transform_1, window_bounds = array<i64: 1, 8, 256>}, {transform_indices = @transform_2, window_bounds = array<i64: 1, 8, 256>}]} {
    %c0 = arith.constant 0 : index
    %c0_0 = arith.constant 0 : index
    %c0_1 = arith.constant 0 : index
    %0 = vector.load %arg4[%c0, %c0_0, %c0_1] : memref<1x8x256xf32, #tpu.memory_space<vmem>>, vector<1x8x256xf32>
    %1 = vector.shape_cast %0 : vector<1x8x256xf32> to vector<8x256xf32>
    %c0_i32 = arith.constant 0 : i32
    %2 = arith.cmpi eq, %arg1, %c0_i32 : i32
    %3 = arith.extui %2 : i1 to i32
    %c0_i32_2 = arith.constant 0 : i32
    %4 = arith.cmpi ne, %3, %c0_i32_2 : i32
    scf.if %4 {
      %c0_i32_4 = arith.constant 0 : i32
      %8 = arith.cmpi eq, %arg2, %c0_i32_4 : i32
      %9 = arith.extui %8 : i1 to i32
      %c0_i32_5 = arith.constant 0 : i32
      %10 = arith.cmpi ne, %9, %c0_i32_5 : i32
      scf.if %10 {
        %cst_12 = arith.constant 0.000000e+00 : f32
        %18 = vector.broadcast %cst_12 : f32 to vector<8x8xf32>
        %c0_13 = arith.constant 0 : index
        %c0_14 = arith.constant 0 : index
        %19 = vector.load %arg6[%c0_13, %c0_14] : memref<8x8xf32, #tpu.memory_space<vmem>>, vector<8x8xf32>
        tpu.vector_store %arg6[%c0_13, %c0_14], %18 {strides = array<i32>} : memref<8x8xf32, #tpu.memory_space<vmem>>, vector<8x8xf32>,
      } else {
      }
      %c0_6 = arith.constant 0 : index
      %c0_7 = arith.constant 0 : index
      %11 = vector.load %arg6[%c0_6, %c0_7] : memref<8x8xf32, #tpu.memory_space<vmem>>, vector<8x8xf32>
      %cst = arith.constant dense<0.000000e+00> : vector<8x8xf32>
      %12 = tpu.matmul %1, %1, %cst {dimension_numbers = #tpu.dot_dimension_numbers<[1], [1], [0], [0], [0, 0, 1, 0], [], []>} : vector<8x256xf32>, vector<8x256xf32>, vector<8x8xf32> -> vector<8x8xf32>
      %13 = arith.addf %11, %12 : vector<8x8xf32>
      %c0_8 = arith.constant 0 : index
      %c0_9 = arith.constant 0 : index
      %14 = vector.load %arg6[%c0_8, %c0_9] : memref<8x8xf32, #tpu.memory_space<vmem>>, vector<8x8xf32>
      tpu.vector_store %arg6[%c0_8, %c0_9], %13 {strides = array<i32>} : memref<8x8xf32, #tpu.memory_space<vmem>>, vector<8x8xf32>,
      %c0_i32_10 = arith.constant 0 : i32
      %15 = arith.cmpi eq, %arg2, %c0_i32_10 : i32
      %16 = arith.extui %15 : i1 to i32
      %c0_i32_11 = arith.constant 0 : i32
      %17 = arith.cmpi ne, %16, %c0_i32_11 : i32
      scf.if %17 {
        %c0_12 = arith.constant 0 : index
        %c0_13 = arith.constant 0 : index
        %18 = vector.load %arg6[%c0_12, %c0_13] : memref<8x8xf32, #tpu.memory_space<vmem>>, vector<8x8xf32>
        %cst_14 = arith.constant dense<0xFF800000> : vector<8xf32>
        %19 = vector.multi_reduction <maximumf>, %18, %cst_14 [1] : vector<8x8xf32> to vector<8xf32>
        %20 = vector.shape_cast %19 : vector<8xf32> to vector<8x1xf32>
        %21 = vector.broadcast %20 : vector<8x1xf32> to vector<8x8xf32>
        %22 = arith.subf %18, %21 : vector<8x8xf32>
        %23 = math.exp %22 : vector<8x8xf32>
        %cst_15 = arith.constant dense<0.000000e+00> : vector<8xf32>
        %24 = vector.multi_reduction <add>, %23, %cst_15 [1] : vector<8x8xf32> to vector<8xf32>
        %25 = vector.shape_cast %24 : vector<8xf32> to vector<8x1xf32>
        %26 = vector.broadcast %25 : vector<8x1xf32> to vector<8x8xf32>
        %27 = arith.divf %23, %26 : vector<8x8xf32>
        %c0_16 = arith.constant 0 : index
        %c0_17 = arith.constant 0 : index
        %28 = vector.load %arg7[%c0_16, %c0_17] : memref<8x8xf32, #tpu.memory_space<vmem>>, vector<8x8xf32>
        tpu.vector_store %arg7[%c0_16, %c0_17], %27 {strides = array<i32>} : memref<8x8xf32, #tpu.memory_space<vmem>>, vector<8x8xf32>,
      } else {
      }
    } else {
    }
    %c1_i32 = arith.constant 1 : i32
    %5 = arith.cmpi eq, %arg1, %c1_i32 : i32
    %6 = arith.extui %5 : i1 to i32
    %c0_i32_3 = arith.constant 0 : i32
    %7 = arith.cmpi ne, %6, %c0_i32_3 : i32
    scf.if %7 {
      %c0_4 = arith.constant 0 : index
      %c0_5 = arith.constant 0 : index
      %8 = vector.load %arg7[%c0_4, %c0_5] : memref<8x8xf32, #tpu.memory_space<vmem>>, vector<8x8xf32>
      %cst = arith.constant dense<0.000000e+00> : vector<8x256xf32>
      %9 = tpu.matmul %8, %1, %cst {dimension_numbers = #tpu.dot_dimension_numbers<[1], [0], [0], [1], [0, 0, 1, 1], [], []>} : vector<8x8xf32>, vector<8x256xf32>, vector<8x256xf32> -> vector<8x256xf32>
      %c0_6 = arith.constant 0 : index
      %10 = memref.load %arg3[%c0_6] : memref<1xf32, #tpu.memory_space<smem>>
      %11 = vector.broadcast %10 : f32 to vector<8x256xf32>
      %12 = arith.mulf %11, %9 : vector<8x256xf32>
      %13 = arith.addf %12, %1 : vector<8x256xf32>
      %c0_7 = arith.constant 0 : index
      %c0_8 = arith.constant 0 : index
      %c0_9 = arith.constant 0 : index
      %14 = vector.load %arg5[%c0_7, %c0_8, %c0_9] : memref<1x8x256xf32, #tpu.memory_space<vmem>>, vector<1x8x256xf32>
      %15 = vector.shape_cast %14 : vector<1x8x256xf32> to vector<8x256xf32>
      %16 = vector.shape_cast %13 : vector<8x256xf32> to vector<1x8x256xf32>
      tpu.vector_store %arg5[%c0_7, %c0_8, %c0_9], %16 {strides = array<i32>} : memref<1x8x256xf32, #tpu.memory_space<vmem>>, vector<1x8x256xf32>,
    } else {
    }
    return
  }
  func.func @transform_0(%arg0: i32, %arg1: i32, %arg2: i32) -> i32 {
    %c0_i32 = arith.constant 0 : i32
    %c0_i32_0 = arith.constant 0 : i32
    return %c0_i32 : i32
  }
  func.func @transform_1(%arg0: i32, %arg1: i32, %arg2: i32) -> (i32, i32, i32) {
    %c0_i32 = arith.constant 0 : i32
    %c0_i32_0 = arith.constant 0 : i32
    return %arg0, %c0_i32, %arg2 : i32, i32, i32
  }
  func.func @transform_2(%arg0: i32, %arg1: i32, %arg2: i32) -> (i32, i32, i32) {
    %0 = arith.muli %arg1, %arg2 : i32
    %c0_i32 = arith.constant 0 : i32
    %c0_i32_0 = arith.constant 0 : i32
    return %arg0, %c0_i32, %0 : i32, i32, i32
  }
}

</mosaic_0001>

<bundles_post_ra>
// kernel: tpu_custom_call.1
= control target key start
LH: loop header
LB: loop body
LE: loop exit
PB: predicated region body
PF: predicated region fallthrough
CT: control target
= control target key end

     0   :  { %s905_s0 = inlined_call_operand.<no memory space> [shape: f32[1], index: 0, kind: input, shape index: {}]   ;;  %s906_s1 = inlined_call_operand.hbm [shape: f32[2,8,256], index: 1, kind: input, shape index: {}]   ;;  %s907_s2 = inlined_call_operand.hbm [shape: f32[2,8,256], index: 2, kind: output, shape index: {}]  }
   0x1   :  { %7 = sst [smem:[#allocation4]] %s905_s0 }
   0x2   :  { %8 = vsyncpa [#allocation6], 0 }
   0x3   :  { %10 = vsyncpa [#allocation6 + $0x1], 0 }
   0x4   :  { %11 = vsyncpa [#allocation7], 0 }
   0x5   :  { %13 = vsyncpa [#allocation7 + $0x1], 0  ;;  %s741_s11 = smov 0   ;;  %s743_s12 = smov 0  }
   0x6   :  { %s745_s13 = smov 0   ;;  %s747_s14 = smov 0  }
   0x7   :  { %s749_s15 = smov 0   ;;  %s751_s16 = smov 0  }
   0x8   :  { %s753_s17 = smov 0   ;;  %s755_s18 = smov 0  }
   0x9 LB: > { %s489_s0 = sadd.s32 4294967295, %s717_s18   ;;  %s490_s19 = sadd.s32 4294967294, %s717_s18   ;;  %s717_s18 = sphi %s755_s18, %s19_s18   ;;  %s713_s17 = sphi %s753_s17, %s920_s17   ;;  %s709_s16 = sphi %s751_s16, %s919_s16   ;;  %s705_s15 = sphi %s749_s15, %s918_s15   ;;  %s701_s14 = sphi %s747_s14, %s917_s14   ;;  %s697_s13 = sphi %s745_s13, %s916_s13   ;;  %s693_s12 = sphi %s743_s12, %s915_s12   ;;  %s689_s11 = sphi %s741_s11, %s914_s11  }
   0xa   : > { %s34_s20 = sadd.s32 1, %s709_s16  ;;  %s38_s21 = sadd.s32 1, %s713_s17 }
   0xb   : > { %p36_p0 = scmp.ge.s32.totalorder %s34_s20, 2  ;;  %s68_s22 = sadd.s32 1, %s697_s13 }
   0xc   : > { %p75_p1 = scmp.ne.s32.totalorder %s697_s13, %s693_s12  ;;  %p76_p2 = scmp.eq.s32.totalorder %s717_s18, 0 }
   0xd   : > { %s922_s20 = smov (%p36_p0, %s34_s20), 0  ;;  %s924_s21 = smov (!%p36_p0, %s38_s21), %s713_s17 }
   0xe   : > { %p792_p3 = por %p76_p2, %p75_p1  ;;  %p81_p4 = scmp.ne.s32.totalorder %s693_s12, %s689_s11 }
   0xf   : > { %p40_p5 = scmp.ge.s32.totalorder %s924_s21, 2  ;;  %p82_p6 = scmp.eq.s32.totalorder %s489_s0, 0 }
  0x10   : > { %p109_p7 = scmp.eq.s32.totalorder %s489_s0, 3  ;;  %p115_p8 = scmp.eq.s32.totalorder %s490_s19, 3 }
  0x11   : > { %s926_s21 = smov (%p40_p5, %s924_s21), 0  ;;  %p800_p9 = por %p82_p6, %p81_p4 }
  0x12   : > { %p804_p10 = por %p109_p7, %p75_p1  ;;  %s63_s26 = ssub.s32 %s713_s17, %s926_s21 }
  0x13   : > { %p810_p11 = por %p115_p8, %p81_p4  ;;  %p66_p12 = scmp.eq.s32.totalorder %s63_s26, 0 }
  0x14   : > { %p521_p13 = scmp.lt.s32.totalorder %s717_s18, 4  ;;  %s138_s28 = sand.u32 1, %s697_s13  }
  0x15   : > { %s911_s27 = scalar_select %p810_p11, 1, 0 }
  0x16   : > { %s817_s29 = scalar_select %p66_p12, %s697_s13, %s68_s22  }
  0x17   : > { %s493_s30 = sshll.u32 %s138_s28, 4  ;;  %s507_s3 = sshll.u32 %s713_s17, 8 }
  0x18   : > { %s150_s6 = scalar_lea.hbm %s906_s1, %s507_s3  ;;  %s142_s7 = scalar_lea.vmem [#allocation5], %s493_s30 }
  0x19   : > { %s152_s8 = sshll.u32 %s142_s7, 4  ;;  %p825_p0 = pnand %p521_p13, %p792_p3  ;;  %s153_s8 = int_to_ptr.vmem [resolvable:$true] %s152_s8 }
  0x1a   : > { %p496_p1 = scmp.ge.s32.totalorder %s717_s18, 1  ;;  %p157_p2 = scmp.lt.s32.totalorder %s717_s18, 5 }
  0x1b   : > { %s139_s10 = scalar_lea.sflag [#allocation6], %s138_s28  ;;  %p595_p4 = pneg %p825_p0 }
  0x1c   : > { %s606_s0 = scalar_lea.vmem %s153_s8, 256  ;;  %s719_s19 = smov [#allocation5]  }
  0x1d   : > { %p607_p5 = scmp.ne.s32.totalorder %s153_s8, %s606_s0  ;;  %s611_s22 = sshll.u32 %s719_s19, 4  ;;  %s612_s22 = int_to_ptr.vmem [resolvable:$false] %s611_s22 }
  0x1e   : > { %s613_s26 = scalar_lea.vmem %s612_s22, 512  ;;  %p614_p8 = scmp.lt.s32.totalorder %s153_s8, %s612_s22 }
  0x1f   : > { %p609_p6 = pnand %p607_p5, %p595_p4  ;;  %p615_p12 = scmp.lt.s32.totalorder %s613_s26, %s606_s0 }
  0x21   : > { %p610_p7 = pneg %p609_p6  ;;  %p616_p3 = por %p615_p12, %p614_p8 }
  0x23   : > { %p617_p13 = pnand %p616_p3, %p610_p7 }
  0x25   : > { %620 = shalt.err (!%p617_p13)
}
  0x26   : > { %516 = dma.hbm_to_vmem [thread:$0]  (!%p825_p0), %s150_s6, 256, %s153_s8, %s139_s10  }
  0x27   : > { %p158_p11 = pnand %p496_p1, %p157_p2 }
  0x28   : > { %s840_s23 = sand.u32 (!%p158_p11), 1, %s693_s12  }
  0x29   : > { %161 = sbr.rel (%p158_p11) target bundleno = 806 (0x326), region = 28  ;;  %s497_s28 = sshll.u32 (!%p158_p11), %s840_s23, 4 }
  0x2a   : > { %s164_s30 = scalar_lea.sflag (!%p158_p11), [#allocation6], %s840_s23  ;;  %s167_s3 = scalar_lea.vmem (!%p158_p11), [#allocation5], %s497_s28 }
  0x2e   : > { %680 = dma.done.wait (%p800_p9), %s164_s30, 256  }
  0x2f   : > { %682 = vsyncadd (%p800_p9), %s164_s30, 4294967040  ;;  %v191_v0 = vld [vmem:[%s167_s3] sm:$0xff]  ;;  %v192_v1 = vld [vmem:[%s167_s3 + $0x8] sm:$0xff]  ;;  %s848_s4 = scalar_lea.vmem [#allocation8], %s497_s28  ;;  %p499_p11 = scmp.ne.s32.totalorder %s701_s14, 0 }
  0x31   : > { %196 = sbr.rel (%p499_p11) target bundleno = 574 (0x23e), region = 36 }
  0x36   : > { %234 = vmatprep.subr.mxu0 %v192_v1  ;;  %268 = vmatprep.mubr.f32.mxu0 %v192_v1  ;;  %vm201_vm0 = vcmask 64512   ;;  %v720_v2 = vmov 0.0  }
  0x37   : > { %235 = vmatpush1.xpose.msra.mxu0 %v191_v0  ;;  %202 = vst.msk [vmem:[#allocation2] sm:$0xff] %vm201_vm0, %v720_v2 }
  0x3a   : > { %269 = vmatmul.mubr.f32.vlgmr.msra.gmra.mxu0 %v191_v0 }
  0x3e   : > { %v203_v3 = vld [vmem:[#allocation2] sm:$0xff] }
  0xfa   : > { %v270_v4 = vpop.f32.mrf.mxu0 }
  0xfb   : > { %v274_v5 = vadd.f32 %v270_v4, %v203_v3 }
  0xfc   : > { %v272_v6 = vpop.f32.mrf.mxu0 }
  0xfd   : > { %276 = vst.msk [vmem:[#allocation2] sm:$0xff] %vm201_vm0, %v274_v5 }
 0x104   : > { %v280_v7 = vld [vmem:[#allocation2] sm:$0xff] }
 0x105   : > { %v281_v8 = vsel %vm201_vm0, %v280_v7, -inf }
 0x106   : > { %282 = vmax.xlane.f32.xlu0 %v281_v8 }
 0x18f   : > { %v283_v9 = vpop.xlane.xlu0 %282 }
 0x190   : > { %v284_v10 = vsub.f32 %v280_v7, %v283_v9 }
 0x192   : > { %v285_v11 = vmul.f32 1.442695, %v284_v10 }
 0x194   : > { %589 = vpow2.f32 %v285_v11 }
 0x1a1   : > { %v590_v12 = vpop.eup %589 }
 0x1a2   : > { %v287_v13 = vsel %vm201_vm0, %v590_v12, 0.0 }
 0x1a3   : > { %288 = vadd.xlane.f32.xlu0 %v287_v13 }
 0x22c   : > { %v289_v14 = vpop.xlane.xlu0 %288 }
 0x22d   : > { %591 = vrcp.f32 %v289_v14 }
 0x23a   : > { %v592_v15 = vpop.eup %591 }
 0x23b   : > { %v291_v16 = vmul.f32 %v592_v15, %v590_v12 }
 0x23d   : > { %292 = vst.msk [vmem:[#allocation3] sm:$0xff] %vm201_vm0, %v291_v16 }
 0x23e PF: > { %p500_p9 = scmp.ne.s32.totalorder %s701_s14, 1 }
 0x23f   : > { %s373_s24 = sld [smem:[#allocation4]] (!%p500_p9) }
 0x240   : > { %296 = sbr.rel (%p500_p9) target bundleno = 783 (0x30f), region = 48 }
 0x245   : > { %332 = vmatprep.subr.mxu0 %v192_v1  ;;  %v297_v17 = vld [vmem:[#allocation3] sm:$0xff]  ;;  %vm298_vm1 = vcmask 64512   ;;  %v721_v18 = vmov 0.0   ;;  %v374_v19 = vstv %s373_s24 }
 0x246   : > { %333 = vmatpush1.msra.mxu0 %v191_v0  ;;  %366 = vmatprep.mubr.f32.mxu0 %v721_v18 }
 0x247   : > { %501 = vmatmul.mubr.msk.f32.vlgmr.msra.gmra.mxu0 %vm298_vm1, %v297_v17 }
 0x307   : > { %v368_v20 = vpop.f32.mrf.mxu0 }
 0x308   : > { %v375_v21 = vmul.f32 %v374_v19, %v368_v20 }
 0x309   : > { %v370_v22 = vpop.f32.mrf.mxu0 }
 0x30a   : > { %v377_v23 = vadd.f32 %v375_v21, %v191_v0  ;;  %v376_v24 = vmul.f32 %v374_v19, %v370_v22 }
 0x30c   : > { %379 = vst [vmem:[%s848_s4] sm:$0xff] %v377_v23  ;;  %v378_v25 = vadd.f32 %v376_v24, %v192_v1 }
 0x30e   : > { %380 = vst [vmem:[%s848_s4 + $0x8] sm:$0xff] %v378_v25 }
 0x30f PF: > { %s508_s14 = sshll.u32 %s705_s15, 8  ;;  %s399_s8 = sshll.u32 %s848_s4, 4  ;;  %s400_s8 = int_to_ptr.vmem [resolvable:$true] %s399_s8 }
 0x310   : > { %s397_s7 = scalar_lea.hbm %s907_s2, %s508_s14  ;;  %s382_s9 = scalar_lea.sflag [#allocation7], %s840_s23 }
 0x311   : > { %s621_s10 = scalar_lea.vmem %s400_s8, 256  ;;  %s722_s0 = smov [#allocation8]  }
 0x312   : > { %p622_p0 = scmp.ne.s32.totalorder %s400_s8, %s621_s10  ;;  %s625_s19 = sshll.u32 %s722_s0, 4  ;;  %s626_s19 = int_to_ptr.vmem [resolvable:$false] %s625_s19 }
 0x313   : > { %s627_s22 = scalar_lea.vmem %s626_s19, 512  ;;  %p628_p4 = scmp.lt.s32.totalorder %s400_s8, %s626_s19 }
 0x314   : > { %p623_p1 = pnand %p622_p0, %p804_p10  ;;  %p629_p5 = scmp.lt.s32.totalorder %s627_s22, %s621_s10 }
 0x316   : > { %p624_p2 = pneg %p623_p1  ;;  %p630_p6 = por %p629_p5, %p628_p4 }
 0x318   : > { %p631_p7 = pnand %p630_p6, %p624_p2 }
 0x31a   : > { %634 = shalt.err (!%p631_p7)
}
 0x31b   : > { %s635_s15 = scalar_lea.hbm %s397_s7, 256  ;;  %s639_s28 = scalar_lea.hbm %s907_s2, 512 }
 0x31c   : > { %p636_p8 = scmp.ne.s32.totalorder %s397_s7, %s635_s15  ;;  %p640_p13 = scmp.lt.s32.totalorder %s397_s7, %s907_s2 }
 0x31d   : > { %p641_p11 = scmp.lt.s32.totalorder %s639_s28, %s635_s15 }
 0x31e   : > { %p637_p12 = pnand %p636_p8, %p804_p10 }
 0x31f   : > { %p642_p9 = por %p641_p11, %p640_p13 }
 0x320   : > { %p638_p3 = pneg %p637_p12 }
 0x322   : > { %p643_p0 = pnand %p642_p9, %p638_p3 }
 0x324   : > { %646 = shalt.err (!%p643_p0)
}
 0x325   : > { %511 = dma.vmem_to_hbm [thread:$0]  (%p804_p10), %s400_s8, 256, %s397_s7, %s382_s9  }
 0x326 PF: > { %p522_p1 = scmp.ge.s32.totalorder %s717_s18, 2  ;;  %s411_s4 = sand.u32 1, %s689_s11  }
 0x327   : > { %p913_p2 = scmp.ne.s32.totalorder %s911_s27, 0  ;;  %s412_s24 = scalar_lea.sflag [#allocation7], %s411_s4 }
 0x329   : > { %p518_p4 = pnand %p522_p1, %p913_p2 }
 0x32b   : > { %p519_p5 = pneg %p518_p4 }
 0x32d   : > { %684 = dma.done.wait (%p519_p5), %s412_s24, 256  }
 0x32e   : > { %686 = vsyncadd (%p519_p5), %s412_s24, 4294967040  ;;  %s19_s18 = sadd.s32 1, %s717_s18   ;;  %s914_s11 = smov %s693_s12 }
 0x32f   : > { %p16_p6 = scmp.ge.s32.totalorder %s19_s18, 6   ;;  %s915_s12 = smov %s697_s13 }
 0x330   : > { %s916_s13 = smov %s817_s29  ;;  %s917_s14 = smov %s709_s16 }
 0x331   : > { %s918_s15 = smov %s713_s17  ;;  %s919_s16 = smov %s922_s20 }
 0x332   : > { %s920_s17 = smov %s926_s21  ;;  %18 = sbr.rel (!%p16_p6) target bundleno = 9 (0x9), region = 89 }
 0x337   :  { %417 = vsyncpa [#allocation6], 1 }
 0x338   :  { %419 = vsyncpa [#allocation6 + $0x1], 1 }
 0x339   :  { %420 = vsyncpa [#allocation7], 1 }
 0x33a   :  { %422 = vsyncpa [#allocation7 + $0x1], 1 }

</bundles_post_ra>
